<compile_context>
chip_gen: v5e
topology: v5e:2x2
jax: 0.10.0
libtpu: 0.0.40
codegen_flags: <defaults>
</compile_context>

<pallas_src>
import jax
import jax.numpy as jnp
from jax import lax
from jax.experimental import pallas as pl
from jax.experimental.pallas import tpu as pltpu

LANE = 128


def spice_forward(images_nchw, targets):
    # Literal SPICEModel.forward(images, targets) -> 0
    return jnp.float32(0.0)


def _round_up(x, m):
    return (x + m - 1) // m * m


def _largest_divisor(n, limit, multiple_of=1):
    """Largest divisor of n that is <= limit and a multiple of `multiple_of`."""
    best = None
    d = 1
    while d * d <= n:
        if n % d == 0:
            for c in (d, n // d):
                if c <= limit and c % multiple_of == 0 and (best is None or c > best):
                    best = c
        d += 1
    return best


def _vmem_capacity_bytes():
    try:
        return int(getattr(pltpu.get_tpu_info(), "vmem_capacity_bytes", 64 << 20))
    except Exception:
        return 64 << 20  # conservative: v7x per-TensorCore VMEM


def _choose_tiles(N, HW, Kc, cf_pad, vmem_cap):
    # >= 2 image tiles whenever N >= 2 so dimension_semantics=("parallel", ...)
    # can shard the leading grid axis across v7x's two TensorCores.
    tile_img = 1
    if N >= 2:
        tile_img = _largest_divisor(N, max(1, min(N // 2, 64))) or 1

    # Live bytes per streamed xcol row at this tile_img: two double-buffered bf16
    # xcol rows plus the f32 matmul-intermediate row.  Target ~16 MiB live when
    # VMEM is 64 MiB (v7x), ~24 MiB when 128 MiB (v5e/v6e) is available.
    live_target = (24 << 20) if vmem_cap >= (96 << 20) else (16 << 20)
    per_row = tile_img * (2 * Kc * 2 + cf_pad * 4)
    rows_budget = max(16, live_target // per_row)

    hw_pad = _round_up(HW, 16)  # zero rows are exact for avg-pool (ReLU(0)=0)
    if hw_pad <= rows_budget:
        tile_hw = hw_pad        # collapse the reduction axis (single-step epilogue)
    else:
        tile_hw = max(16, (rows_budget // 16) * 16)   # sublane-aligned, bounded block
        hw_pad = _round_up(hw_pad, tile_hw)
    return tile_img, tile_hw, hw_pad


# -----------------------------------------------------------------------------
# Fused kernel: conv(im2col matmul)+ReLU -> global avg pool -> L2 norm -> head
# -----------------------------------------------------------------------------
def spice_extract_and_sem(images_nchw, params, *, tile_img=None, tile_hw=None):
    wconv_t, bconv, whead_t, bhead = params
    N, Cin, H, W = images_nchw.shape
    Cfeat = int(wconv_t.shape[0])
    K = int(whead_t.shape[0])
    HW = H * W
    Kc = 9 * Cin + 1                       # im2col taps + ones column (folds conv bias)
    cf_pad = _round_up(Cfeat, LANE)        # lane-dense conv / feat stores
    k_pad = _round_up(K, LANE)             # lane-dense head / prob stores
    inv_hw = 1.0 / float(HW)

    vmem_cap = _vmem_capacity_bytes()
    auto_img, auto_hw, hw_pad = _choose_tiles(N, HW, Kc, cf_pad, vmem_cap)
    TILE_IMG = int(tile_img) if tile_img is not None else auto_img
    TILE_HW = int(tile_hw) if tile_hw is not None else auto_hw
    if tile_hw is not None:
        assert TILE_HW % 16 == 0, "tile_hw must be a multiple of 16 (bf16 sublanes)"
        hw_pad = _round_up(HW, TILE_HW)
    assert N % TILE_IMG == 0, "batch must be divisible by the image tile"
    n_img_tiles = N // TILE_IMG
    n_row_tiles = hw_pad // TILE_HW

    # ---- wrapper glue (layout only): NCHW -> NHWC, pad, im2col, channel pads ----
    x = jnp.transpose(images_nchw, (0, 2, 3, 1)).astype(jnp.float32)
    xp = jnp.pad(x, ((0, 0), (1, 1), (1, 1), (0, 0)))
    cols = [xp[:, kh:kh + H, kw:kw + W, :].reshape(N, HW, Cin)
            for kh in range(3) for kw in range(3)]
    cols.append(jnp.ones((N, HW, 1), jnp.float32))                 # bias column
    xcol = jnp.concatenate(cols, axis=2).astype(jnp.bfloat16)      # (N, HW, Kc)
    if hw_pad > HW:
        # zero rows (incl. zero bias column) contribute ReLU(0)=0 to the pool: exact
        xcol = jnp.pad(xcol, ((0, 0), (0, hw_pad - HW), (0, 0)))
    # TODO(synk): xcol is still a ~9x HBM expansion of the NHWC image; the biggest
    # remaining v5e win is streaming padded NHWC row blocks with a 1-row halo and
    # accumulating the 9 shifted-tap matmuls in-kernel instead of materialized im2col.

    # conv weight (Cout, Cin, 3, 3) -> (kh, kw, cin, cout) -> (9*Cin, Cfeat), + bias row,
    # then zero-pad output channels to cf_pad (pad channels stay exactly 0 after ReLU).
    wconv = jnp.transpose(wconv_t, (2, 3, 1, 0)).reshape(9 * Cin, Cfeat)
    wconv_b = jnp.concatenate([wconv, bconv.reshape(1, Cfeat)], axis=0)
    wconv_b = jnp.pad(wconv_b, ((0, 0), (0, cf_pad - Cfeat))).astype(jnp.bfloat16)

    whead = jnp.pad(jnp.transpose(whead_t, (1, 0)).astype(jnp.float32),
                    ((0, cf_pad - Cfeat), (0, k_pad - K)))          # (cf_pad, k_pad)
    bhead2d = jnp.pad(bhead.reshape(1, K).astype(jnp.float32),
                      ((0, 0), (0, k_pad - K)), constant_values=-1e30)  # pad logits -> 0 prob

    # ------------------------- kernel bodies (closures) -------------------------
    def _load_x2d(xcol_ref):
        if TILE_IMG == 1:
            return xcol_ref[0]                                       # (TILE_HW, Kc)
        return xcol_ref[...].reshape(TILE_IMG * TILE_HW, Kc)         # layout-trivial collapse

    def _pool_sum(fmap):                                             # -> (TILE_IMG, cf_pad)
        if TILE_IMG == 1:
            return jnp.sum(fmap, axis=0, keepdims=True)
        return jnp.sum(fmap.reshape(TILE_IMG, TILE_HW, cf_pad), axis=1)

    def _head_epilogue(pooled, whead_ref, bhead_ref, feat_ref, prob_ref):
        # F.normalize(dim=1, eps=1e-12): x * rsqrt(max(||x||^2, 1e-24))  (EUP rsqrt)
        ssq = jnp.sum(pooled * pooled, axis=1, keepdims=True)
        fnorm = pooled * lax.rsqrt(jnp.maximum(ssq, 1e-24))
        feat_ref[...] = fnorm[None]
        logits = jnp.dot(fnorm, whead_ref[...],
                         preferred_element_type=jnp.float32) + bhead_ref[...]
        m = jnp.max(logits, axis=1, keepdims=True)
        e = jnp.exp(logits - m)
        # exact reciprocal (once per image tile): rows sum to 1 for downstream head ops
        prob_ref[...] = (e / jnp.sum(e, axis=1, keepdims=True))[None]

    def kernel_1d(xcol_ref, wconv_ref, whead_ref, bhead_ref, feat_ref, prob_ref):
        # 3x3 conv (pad=1) as ONE im2col matmul for the whole image tile + ReLU,
        # then avg-pool / L2-norm / head / softmax in a straight epilogue.
        fmap = jnp.dot(_load_x2d(xcol_ref), wconv_ref[...],
                       preferred_element_type=jnp.float32)
        fmap = jnp.maximum(fmap, 0.0)                  # conv bias folded into matmul
        _head_epilogue(_pool_sum(fmap) * inv_hw, whead_ref, bhead_ref,
                       feat_ref, prob_ref)

    def kernel_2d(xcol_ref, wconv_ref, whead_ref, bhead_ref, feat_ref, prob_ref,
                  acc_ref):
        r = pl.program_id(1)

        @pl.when(r == 0)
        def _init():
            acc_ref[...] = jnp.zeros_like(acc_ref)

        fmap = jnp.dot(_load_x2d(xcol_ref), wconv_ref[...],
                       preferred_element_type=jnp.float32)
        acc_ref[...] += _pool_sum(jnp.maximum(fmap, 0.0))            # one update / step

        @pl.when(r == pl.num_programs(1) - 1)
        def _finish():
            _head_epilogue(acc_ref[...] * inv_hw, whead_ref, bhead_ref,
                           feat_ref, prob_ref)

    # ------------------------- grid / specs / VMEM budget ------------------------
    out_shape = (jax.ShapeDtypeStruct((n_img_tiles, TILE_IMG, cf_pad), jnp.float32),
                 jax.ShapeDtypeStruct((n_img_tiles, TILE_IMG, k_pad), jnp.float32))

    if n_row_tiles == 1:
        kernel = kernel_1d
        grid = (n_img_tiles,)
        in_specs = [
            pl.BlockSpec((TILE_IMG, TILE_HW, Kc), lambda i: (i, 0, 0)),
            pl.BlockSpec((Kc, cf_pad), lambda i: (0, 0)),
            pl.BlockSpec((cf_pad, k_pad), lambda i: (0, 0)),
            pl.BlockSpec((1, k_pad), lambda i: (0, 0)),
        ]
        out_specs = (pl.BlockSpec((1, TILE_IMG, cf_pad), lambda i: (i, 0, 0)),
                     pl.BlockSpec((1, TILE_IMG, k_pad), lambda i: (i, 0, 0)))
        scratch_shapes = []
        dim_sem = ("parallel",)
    else:
        kernel = kernel_2d
        grid = (n_img_tiles, n_row_tiles)
        in_specs = [
            pl.BlockSpec((TILE_IMG, TILE_HW, Kc), lambda i, r: (i, r, 0)),
            pl.BlockSpec((Kc, cf_pad), lambda i, r: (0, 0)),
            pl.BlockSpec((cf_pad, k_pad), lambda i, r: (0, 0)),
            pl.BlockSpec((1, k_pad), lambda i, r: (0, 0)),
        ]
        out_specs = (pl.BlockSpec((1, TILE_IMG, cf_pad), lambda i, r: (i, 0, 0)),
                     pl.BlockSpec((1, TILE_IMG, k_pad), lambda i, r: (i, 0, 0)))
        scratch_shapes = [pltpu.VMEM((TILE_IMG, cf_pad), jnp.float32)]
        dim_sem = ("parallel", "arbitrary")

    # vmem_limit from actual block sizes (double-buffered input, f32 matmul
    # intermediate, resident weights, output blocks, accumulator) + headroom,
    # clamped to 3/4 of physical capacity (48 MiB on v7x, 96 MiB on v5e/v6e).
    xcol_blk = TILE_IMG * TILE_HW * Kc * 2
    fmap_blk = TILE_IMG * TILE_HW * cf_pad * 4
    weights = Kc * cf_pad * 2 + cf_pad * k_pad * 4 + k_pad * 4
    out_blk = TILE_IMG * (cf_pad + k_pad) * 4
    acc_blk = TILE_IMG * cf_pad * 4
    need = 2 * xcol_blk + fmap_blk + 2 * weights + 2 * out_blk + acc_blk
    vmem_limit = int(min(max(2 * need + (8 << 20), 32 << 20), vmem_cap * 3 // 4))
    # NOTE: if DMA remains exposed on v5e after growing tiles, the xcol BlockSpec
    # can additionally take pipeline_mode=pl.Buffered(3); kept at depth 2 here to
    # protect the v7x 64 MiB VMEM budget.

    feat3, prob3 = pl.pallas_call(
        kernel,
        out_shape=out_shape,
        grid=grid,
        in_specs=in_specs,
        out_specs=out_specs,
        scratch_shapes=scratch_shapes,
        compiler_params=pltpu.CompilerParams(
            dimension_semantics=dim_sem,
            vmem_limit_bytes=vmem_limit,
        ),
    )(xcol, wconv_b, whead, bhead2d)

    feat = feat3.reshape(N, cf_pad)[:, :Cfeat]
    prob = prob3.reshape(N, k_pad)[:, :K]
    return feat, prob


# -----------------------------------------------------------------------------
# Pure-JAX reference (same bf16-input / f32-accumulate numerics as the kernel)
# -----------------------------------------------------------------------------
def _reference(images_nchw, params):
    wconv_t, bconv, whead_t, bhead = params
    x = images_nchw.astype(jnp.bfloat16)
    w = wconv_t.astype(jnp.bfloat16)
    fmap = lax.conv_general_dilated(
        x, w, window_strides=(1, 1), padding=((1, 1), (1, 1)),
        dimension_numbers=("NCHW", "OIHW", "NCHW"),
        preferred_element_type=jnp.float32)
    bias = bconv.astype(jnp.bfloat16).astype(jnp.float32).reshape(1, -1, 1, 1)
    fmap = jnp.maximum(fmap + bias, 0.0)
    pooled = jnp.mean(fmap, axis=(2, 3))                                  # (N, Cfeat)
    nrm = jnp.sqrt(jnp.sum(pooled * pooled, axis=1, keepdims=True))
    fnorm = pooled / jnp.maximum(nrm, 1e-12)
    logits = fnorm @ whead_t.astype(jnp.float32).T + bhead.reshape(1, -1)
    prob = jax.nn.softmax(logits, axis=1)
    return fnorm, prob


if __name__ == "__main__":
    # Small shapes consistent with the module's image pipeline
    N, Cin, H, W = 2, 4, 16, 16
    Cfeat, K = 32, 8

    key = jax.random.PRNGKey(0)
    k_x, k_wc, k_bc, k_wh, k_bh, k_t = jax.random.split(key, 6)

    images = jax.random.normal(k_x, (N, Cin, H, W), dtype=jnp.float32)
    targets = jax.random.randint(k_t, (N,), 0, K)                         # unused by forward()

    # Deterministic synthetic parameters (PyTorch-shaped)
    wconv_t = 0.1 * jax.random.normal(k_wc, (Cfeat, Cin, 3, 3), dtype=jnp.float32)
    bconv = 0.05 * jax.random.normal(k_bc, (Cfeat,), dtype=jnp.float32)
    whead_t = 0.1 * jax.random.normal(k_wh, (K, Cfeat), dtype=jnp.float32)
    bhead = 0.05 * jax.random.normal(k_bh, (K,), dtype=jnp.float32)
    params = (wconv_t, bconv, whead_t, bhead)

    # forward() semantics (literally 0)
    zero = jax.block_until_ready(spice_forward(images, targets))
    assert float(zero) == 0.0

    feat_ref, prob_ref = _reference(images, params)

    # 1) Auto tiling: H*W fits a single block -> collapsed 1-D grid with two
    #    image tiles ("parallel" axis feeds both v7x TensorCores).
    feat, prob = spice_extract_and_sem(images, params)
    feat = jax.block_until_ready(feat)
    prob = jax.block_until_ready(prob)
    assert feat.shape == (N, Cfeat) and prob.shape == (N, K)
    assert jnp.allclose(feat, feat_ref, rtol=2e-3, atol=2e-3)
    assert jnp.allclose(prob, prob_ref, rtol=5e-3, atol=3e-3)
    assert jnp.allclose(jnp.sum(prob, axis=1), 1.0, atol=1e-5)

    # 2) Forced row chunking: exercises the 2-D ("parallel","arbitrary") reduction
    #    pipeline with the VMEM pooling accumulator + pl.when epilogue.
    feat2, prob2 = spice_extract_and_sem(images, params, tile_img=1, tile_hw=64)
    feat2 = jax.block_until_ready(feat2)
    prob2 = jax.block_until_ready(prob2)
    assert jnp.allclose(feat2, feat_ref, rtol=2e-3, atol=2e-3)
    assert jnp.allclose(prob2, prob_ref, rtol=5e-3, atol=3e-3)

    # TODO(synk): head.select_samples / local_consistency / head.loss are
    # data-dependent routines of the (unspecified) head and are not kernelized.
    print("KERNEL_OK")
</pallas_src>

<mosaic_0001>
module attributes {stable_mosaic.version = 11 : i64} {
  func.func @kernel_1d(%arg0: i32, %arg1: memref<1x256x37xbf16, #tpu.memory_space<vmem>>, %arg2: memref<37x128xbf16, #tpu.memory_space<vmem>>, %arg3: memref<128x128xf32, #tpu.memory_space<vmem>>, %arg4: memref<1x128xf32, #tpu.memory_space<vmem>>, %arg5: memref<1x1x128xf32, #tpu.memory_space<vmem>>, %arg6: memref<1x1x128xf32, #tpu.memory_space<vmem>>) attributes {dimension_semantics = [#tpu.dimension_semantics<parallel>], iteration_bounds = array<i64: 2>, scalar_prefetch = 0 : i64, scratch_operands = 0 : i64, tpu.core_type = #tpu.core_type<tc>, window_params = [{transform_indices = @transform_0, window_bounds = array<i64: 1, 256, 37>}, {pipeline_mode = #tpu.pipeline_mode<synchronous>, transform_indices = @transform_1, window_bounds = array<i64: 37, 128>}, {pipeline_mode = #tpu.pipeline_mode<synchronous>, transform_indices = @transform_2, window_bounds = array<i64: 128, 128>}, {pipeline_mode = #tpu.pipeline_mode<synchronous>, transform_indices = @transform_3, window_bounds = array<i64: 1, 128>}, {transform_indices = @transform_4, window_bounds = array<i64: 1, 1, 128>}, {transform_indices = @transform_5, window_bounds = array<i64: 1, 1, 128>}]} {
    %c0 = arith.constant 0 : index
    %c0_0 = arith.constant 0 : index
    %c0_1 = arith.constant 0 : index
    %0 = vector.load %arg1[%c0, %c0_0, %c0_1] : memref<1x256x37xbf16, #tpu.memory_space<vmem>>, vector<1x256x37xbf16>
    %1 = vector.shape_cast %0 : vector<1x256x37xbf16> to vector<256x37xbf16>
    %c0_2 = arith.constant 0 : index
    %c0_3 = arith.constant 0 : index
    %2 = vector.load %arg2[%c0_2, %c0_3] : memref<37x128xbf16, #tpu.memory_space<vmem>>, vector<37x128xbf16>
    %cst = arith.constant dense<0.000000e+00> : vector<256x128xf32>
    %3 = tpu.matmul %1, %2, %cst {dimension_numbers = #tpu.dot_dimension_numbers<[1], [0], [0], [1], [0, 0, 1, 1], [], []>} : vector<256x37xbf16>, vector<37x128xbf16>, vector<256x128xf32> -> vector<256x128xf32>
    %cst_4 = arith.constant 0.000000e+00 : f32
    %4 = vector.broadcast %cst_4 : f32 to vector<256x128xf32>
    %5 = arith.maximumf %3, %4 : vector<256x128xf32>
    %cst_5 = arith.constant dense<0.000000e+00> : vector<128xf32>
    %6 = vector.multi_reduction <add>, %5, %cst_5 [0] : vector<256x128xf32> to vector<128xf32>
    %7 = vector.shape_cast %6 : vector<128xf32> to vector<1x128xf32>
    %cst_6 = arith.constant 3.906250e-03 : f32
    %8 = vector.broadcast %cst_6 : f32 to vector<1x128xf32>
    %9 = arith.mulf %7, %8 : vector<1x128xf32>
    %10 = arith.mulf %9, %9 : vector<1x128xf32>
    %cst_7 = arith.constant dense<0.000000e+00> : vector<1xf32>
    %11 = vector.multi_reduction <add>, %10, %cst_7 [1] : vector<1x128xf32> to vector<1xf32>
    %12 = vector.shape_cast %11 : vector<1xf32> to vector<1x1xf32>
    %cst_8 = arith.constant 1.000000e-24 : f32
    %13 = vector.broadcast %cst_8 : f32 to vector<1x1xf32>
    %14 = arith.maximumf %12, %13 : vector<1x1xf32>
    %15 = math.rsqrt %14 : vector<1x1xf32>
    %16 = vector.broadcast %15 : vector<1x1xf32> to vector<1x128xf32>
    %17 = arith.mulf %9, %16 : vector<1x128xf32>
    %18 = vector.shape_cast %17 : vector<1x128xf32> to vector<1x1x128xf32>
    %c0_9 = arith.constant 0 : index
    %c0_10 = arith.constant 0 : index
    %c0_11 = arith.constant 0 : index
    %19 = vector.load %arg5[%c0_9, %c0_10, %c0_11] : memref<1x1x128xf32, #tpu.memory_space<vmem>>, vector<1x1x128xf32>
    tpu.vector_store %arg5[%c0_9, %c0_10, %c0_11], %18 {strides = array<i32>} : memref<1x1x128xf32, #tpu.memory_space<vmem>>, vector<1x1x128xf32>,
    %c0_12 = arith.constant 0 : index
    %c0_13 = arith.constant 0 : index
    %20 = vector.load %arg3[%c0_12, %c0_13] : memref<128x128xf32, #tpu.memory_space<vmem>>, vector<128x128xf32>
    %cst_14 = arith.constant dense<0.000000e+00> : vector<1x128xf32>
    %21 = tpu.matmul %17, %20, %cst_14 {dimension_numbers = #tpu.dot_dimension_numbers<[1], [0], [0], [1], [0, 0, 1, 1], [], []>} : vector<1x128xf32>, vector<128x128xf32>, vector<1x128xf32> -> vector<1x128xf32>
    %c0_15 = arith.constant 0 : index
    %c0_16 = arith.constant 0 : index
    %22 = vector.load %arg4[%c0_15, %c0_16] : memref<1x128xf32, #tpu.memory_space<vmem>>, vector<1x128xf32>
    %23 = arith.addf %21, %22 : vector<1x128xf32>
    %cst_17 = arith.constant dense<0xFF800000> : vector<1xf32>
    %24 = vector.multi_reduction <maximumf>, %23, %cst_17 [1] : vector<1x128xf32> to vector<1xf32>
    %25 = vector.shape_cast %24 : vector<1xf32> to vector<1x1xf32>
    %26 = vector.broadcast %25 : vector<1x1xf32> to vector<1x128xf32>
    %27 = arith.subf %23, %26 : vector<1x128xf32>
    %28 = math.exp %27 : vector<1x128xf32>
    %cst_18 = arith.constant dense<0.000000e+00> : vector<1xf32>
    %29 = vector.multi_reduction <add>, %28, %cst_18 [1] : vector<1x128xf32> to vector<1xf32>
    %30 = vector.shape_cast %29 : vector<1xf32> to vector<1x1xf32>
    %31 = vector.broadcast %30 : vector<1x1xf32> to vector<1x128xf32>
    %32 = arith.divf %28, %31 : vector<1x128xf32>
    %33 = vector.shape_cast %32 : vector<1x128xf32> to vector<1x1x128xf32>
    %c0_19 = arith.constant 0 : index
    %c0_20 = arith.constant 0 : index
    %c0_21 = arith.constant 0 : index
    %34 = vector.load %arg6[%c0_19, %c0_20, %c0_21] : memref<1x1x128xf32, #tpu.memory_space<vmem>>, vector<1x1x128xf32>
    tpu.vector_store %arg6[%c0_19, %c0_20, %c0_21], %33 {strides = array<i32>} : memref<1x1x128xf32, #tpu.memory_space<vmem>>, vector<1x1x128xf32>,
    return
  }
  func.func @transform_0(%arg0: i32) -> (i32, i32, i32) {
    %c0_i32 = arith.constant 0 : i32
    %c0_i32_0 = arith.constant 0 : i32
    %c0_i32_1 = arith.constant 0 : i32
    return %arg0, %c0_i32, %c0_i32_0 : i32, i32, i32
  }
  func.func @transform_1(%arg0: i32) -> (i32, i32) {
    %c0_i32 = arith.constant 0 : i32
    %c0_i32_0 = arith.constant 0 : i32
    %c0_i32_1 = arith.constant 0 : i32
    return %c0_i32, %c0_i32_0 : i32, i32
  }
  func.func @transform_2(%arg0: i32) -> (i32, i32) {
    %c0_i32 = arith.constant 0 : i32
    %c0_i32_0 = arith.constant 0 : i32
    %c0_i32_1 = arith.constant 0 : i32
    return %c0_i32, %c0_i32_0 : i32, i32
  }
  func.func @transform_3(%arg0: i32) -> (i32, i32) {
    %c0_i32 = arith.constant 0 : i32
    %c0_i32_0 = arith.constant 0 : i32
    %c0_i32_1 = arith.constant 0 : i32
    return %c0_i32, %c0_i32_0 : i32, i32
  }
  func.func @transform_4(%arg0: i32) -> (i32, i32, i32) {
    %c0_i32 = arith.constant 0 : i32
    %c0_i32_0 = arith.constant 0 : i32
    %c0_i32_1 = arith.constant 0 : i32
    return %arg0, %c0_i32, %c0_i32_0 : i32, i32, i32
  }
  func.func @transform_5(%arg0: i32) -> (i32, i32, i32) {
    %c0_i32 = arith.constant 0 : i32
    %c0_i32_0 = arith.constant 0 : i32
    %c0_i32_1 = arith.constant 0 : i32
    return %arg0, %c0_i32, %c0_i32_0 : i32, i32, i32
  }
}

</mosaic_0001>

<bundles_post_ra>
// kernel: tpu_custom_call.1
= control target key start
LH: loop header
LB: loop body
LE: loop exit
PB: predicated region body
PF: predicated region fallthrough
CT: control target
= control target key end

     0   :  { %11 = vsyncpa [#allocation3], 0  ;;  %s1279_s0 = inlined_call_operand.vmem [shape: bf16[2,256,37], index: 0, kind: input, shape index: {}]   ;;  %s1280_s1 = inlined_call_operand.vmem [shape: bf16[37,128], index: 1, kind: input, shape index: {}]   ;;  %s1281_s2 = inlined_call_operand.vmem [shape: f32[128,128], index: 2, kind: input, shape index: {}]   ;;  %s1282_s3 = inlined_call_operand.vmem [shape: f32[1,128], index: 3, kind: input, shape index: {}]   ;;  %s1283_s4 = inlined_call_operand.hbm [shape: f32[2,1,128], index: 4, kind: output, shape index: {0}]   ;;  %s1284_s5 = inlined_call_operand.hbm [shape: f32[2,1,128], index: 5, kind: output, shape index: {1}]  }
   0x1   :  { %13 = vsyncpa [#allocation3 + $0x1], 0 }
   0x2   :  { %14 = vsyncpa [#allocation5], 0 }
   0x3   :  { %16 = vsyncpa [#allocation5 + $0x1], 0  ;;  %s1074_s18 = smov 0   ;;  %s1076_s19 = smov 0  }
   0x4   :  { %s1078_s20 = smov 0   ;;  %s1080_s21 = smov 0  }
   0x5 LB: > { %s1095_s22 = sadd.s32 4294967295, %s1041_s21   ;;  %s772_s23 = sadd.s32 4294967294, %s1041_s21   ;;  %s1041_s21 = sphi %s1080_s21, %s1290_s21   ;;  %s1037_s20 = sphi %s1078_s20, %s1289_s20   ;;  %s1033_s19 = sphi %s1076_s19, %s1288_s19   ;;  %s1029_s18 = sphi %s1074_s18, %s1287_s18  }
   0x6   : > { %s1099_s24 = sadd.s32 1, %s1041_s21   ;;  %s118_s25 = sadd.s32 1, %s1037_s20 }
   0x7   : > { %s115_s26 = ssub.s32 %s1041_s21, %s1099_s24  ;;  %p128_p0 = scmp.ne.s32.totalorder %s1037_s20, %s1033_s19 }
   0x8   : > { %p116_p1 = scmp.eq.s32.totalorder %s115_s26, 0  ;;  %p129_p2 = scmp.eq.s32.totalorder %s1095_s22, 1 }
   0x9   : > { %p134_p3 = scmp.ne.s32.totalorder %s1033_s19, %s1029_s18  ;;  %p135_p4 = scmp.eq.s32.totalorder %s772_s23, 1 }
   0xa   : > { %s1110_s27 = scalar_select %p116_p1, %s1037_s20, %s118_s25  }
   0xb   : > { %p1112_p5 = por %p129_p2, %p128_p0  ;;  %p1116_p6 = por %p135_p4, %p134_p3 }
   0xc   : > { %p775_p7 = scmp.ge.s32.totalorder %s1041_s21, 1  ;;  %p196_p8 = scmp.lt.s32.totalorder %s1041_s21, 3 }
   0xe   : > { %p197_p9 = pnand %p775_p7, %p196_p8 }
   0xf   : > { %p227_p10 = scmp.lt.s32.totalorder (!%p197_p9), %s1095_s22, 1  ;;  %s1225_s16 = sand.u32 (!%p197_p9), 1, %s1033_s19  }
  0x10   : > { %200 = sbr.rel (%p197_p9) target bundleno = 834 (0x342), region = 36  ;;  %s220_s17 = scalar_lea.vmem (!%p197_p9), [#allocation2], %s1225_s16 }
  0x11   : > { %s672_s6 = scalar_lea.hbm (!%p197_p9), %s1283_s4, %s1095_s22  ;;  %s660_s9 = scalar_lea.sflag (!%p197_p9), [#allocation3], %s1225_s16 }
  0x12   : > { %s676_s8 = sshll.u32 (!%p197_p9), %s672_s6, 4  ;;  %s967_s14 = scalar_lea.hbm (!%p197_p9), %s1283_s4, 2  ;;  %s677_s8 = int_to_ptr.hbm [resolvable:$true] %s676_s8 }
  0x15   : > { %v269_v0 = vld [vmem:[%s1280_s1 + $0x10] sm:$0x7]  ;;  %vm414_vm0 = vcmask 1041408   ;;  %vm415_vm1 = vcmask 1042432   ;;  %v1043_v2 = vmov 65535   ;;  %s228_s7 = scalar_select %p227_p10, %s1095_s22, 1 }
  0x16   : > { %v359_v1 = vunpack.c.l.b16 %v269_v0  ;;  %v416_v3 = vsel %vm414_vm0, 4294967295, %v1043_v2  ;;  %v886_v7 = vld [vmem:[%s1280_s1 + $0x8] sm:$0xff]  ;;  %v885_v8 = vld [vmem:[%s1280_s1] sm:$0xff]  ;;  %vm365_vm2 = vcmask 302080   ;;  %vm633_vm6 = vcmask 1040384  }
  0x17   : > { %v417_v4 = vsel %vm415_vm1, %v416_v3, 0  ;;  %s868_s10 = sshll.u32 %s228_s7, 7  ;;  %s674_s7 = sshll.u32 %s220_s17, 4  ;;  %s675_s7 = int_to_ptr.vmem [resolvable:$true] %s674_s7 }
  0x18   : > { %v362_v5 = vpack.c.b16 %v359_v1, %v359_v1  ;;  %s1136_s15 = scalar_lea.vmem %s1279_s0, %s868_s10  ;;  %s961_s10 = sshra.s32 %s677_s8, 4  ;;  %s962_s10 = int_to_ptr.hbm [resolvable:$true] %s961_s10 }
  0x19   : > { %v869_v9 = vld [vmem:[%s1136_s15] sm:$0xff]  ;;  %v876_v10 = vld [vmem:[%s1136_s15 + $0x38] sm:$0xff]  ;;  %v870_v12 = vld [vmem:[%s1136_s15 + $0x8] sm:$0xff]  ;;  %s963_s11 = scalar_lea.hbm %s962_s10, 1  ;;  %p968_p0 = scmp.lt.s32.totalorder %s962_s10, %s1283_s4 }
  0x1a   : > { %v419_v6 = vand.u32 %v417_v4, %v362_v5  ;;  %v881_v11 = vld [vmem:[%s1136_s15 + $0x60] sm:$0xff]  ;;  %v874_v14 = vld [vmem:[%s1136_s15 + $0x28] sm:$0xff]  ;;  %v871_v16 = vld [vmem:[%s1136_s15 + $0x10] sm:$0xff]  ;;  %p964_p11 = scmp.ne.s32.totalorder %s962_s10, %s963_s11  ;;  %p969_p1 = scmp.lt.s32.totalorder %s967_s14, %s963_s11 }
  0x1b   : > { %v877_v13 = vld [vmem:[%s1136_s15 + $0x40] sm:$0xff]  ;;  %v882_v15 = vld [vmem:[%s1136_s15 + $0x68] sm:$0xff]  ;;  %v875_v18 = vld [vmem:[%s1136_s15 + $0x30] sm:$0xff] }
  0x1c   : > { %426 = vmatpush.bf16.msra.mxu0 %v419_v6  ;;  %888 = vmatpush.bf16.msra.mxu2 %v419_v6  ;;  %v878_v17 = vld [vmem:[%s1136_s15 + $0x48] sm:$0xff]  ;;  %v883_v19 = vld [vmem:[%s1136_s15 + $0x70] sm:$0xff]  ;;  %v872_v20 = vld [vmem:[%s1136_s15 + $0x18] sm:$0xff]  ;;  %p965_p12 = pnand %p964_p11, %p1112_p5  ;;  %p970_p2 = por %p969_p1, %p968_p0 }
  0x1d   : > { %889 = vmatpush.bf16.msra.mxu3 %v419_v6  ;;  %887 = vmatpush.bf16.msra.mxu1 %v419_v6  ;;  %v879_v21 = vld [vmem:[%s1136_s15 + $0x50] sm:$0xff]  ;;  %v884_v22 = vld [vmem:[%s1136_s15 + $0x78] sm:$0xff]  ;;  %v873_v23 = vld [vmem:[%s1136_s15 + $0x20] sm:$0xff] }
  0x1e   : > { %v880_v24 = vld [vmem:[%s1136_s15 + $0x58] sm:$0xff]  ;;  %p966_p13 = pneg %p965_p12 }
  0x20   : > { %427 = vmatpush.bf16.msra.mxu0 %v886_v7  ;;  %891 = vmatpush.bf16.msra.mxu2 %v886_v7  ;;  %p971_p3 = pnand %p970_p2, %p966_p13 }
  0x21   : > { %892 = vmatpush.bf16.msra.mxu3 %v886_v7  ;;  %890 = vmatpush.bf16.msra.mxu1 %v886_v7 }
  0x24   : > { %428 = vmatpush.bf16.msra.mxu0 %v885_v8  ;;  %894 = vmatpush.bf16.msra.mxu2 %v885_v8 }
  0x25   : > { %895 = vmatpush.bf16.msra.mxu3 %v885_v8  ;;  %893 = vmatpush.bf16.msra.mxu1 %v885_v8 }
  0x27   : > { %850 = vmatmul.msk.bf16.vlgmr.msra.gmra.mxu0 %vm365_vm2, %v869_v9  ;;  %857 = vmatmul.msk.bf16.vlgmr.msra.gmra.mxu2 %vm365_vm2, %v876_v10 }
  0x28   : > { %862 = vmatmul.msk.bf16.vlgmr.msra.gmra.mxu3 %vm365_vm2, %v881_v11  ;;  %855 = vmatmul.msk.bf16.vlgmr.msra.gmra.mxu1 %vm365_vm2, %v874_v14 }
  0x37   : > { %851 = vmatmul.msk.bf16.gmra.mxu0 %vm365_vm2, %v870_v12  ;;  %858 = vmatmul.msk.bf16.gmra.mxu2 %vm365_vm2, %v877_v13 }
  0x38   : > { %863 = vmatmul.msk.bf16.gmra.mxu3 %vm365_vm2, %v882_v15  ;;  %856 = vmatmul.msk.bf16.gmra.mxu1 %vm365_vm2, %v875_v18 }
  0x47   : > { %852 = vmatmul.msk.bf16.gmra.mxu0 %vm365_vm2, %v871_v16  ;;  %859 = vmatmul.msk.bf16.gmra.mxu2 %vm365_vm2, %v878_v17 }
  0x48   : > { %864 = vmatmul.msk.bf16.gmra.mxu3 %vm365_vm2, %v883_v19 }
  0x57   : > { %853 = vmatmul.msk.bf16.gmra.mxu0 %vm365_vm2, %v872_v20  ;;  %860 = vmatmul.msk.bf16.gmra.mxu2 %vm365_vm2, %v879_v21 }
  0x58   : > { %865 = vmatmul.msk.bf16.gmra.mxu3 %vm365_vm2, %v884_v22 }
  0x67   : > { %854 = vmatmul.msk.bf16.gmra.mxu0 %vm365_vm2, %v873_v23  ;;  %861 = vmatmul.msk.bf16.gmra.mxu2 %vm365_vm2, %v880_v24 }
  0xa4   : > { %v430_v25 = vpop.f32.mrf.mxu0 }
  0xa5   : > { %v455_v36 = vpop.f32.mrf.mxu1  ;;  %v510_v42 = vmax.f32 %v430_v25, 0.0 }
  0xa6   : > { %v520_v3 = vmax.f32 %v455_v36, 0.0 }
  0xaa   : > { %v465_v27 = vpop.f32.mrf.mxu2 }
  0xab   : > { %v1170_v35 = vpop.f32.mrf.mxu3  ;;  %v524_v13 = vmax.f32 %v465_v27, 0.0 }
  0xac   : > { %v432_v26 = vpop.f32.mrf.mxu0 }
  0xad   : > { %v511_v40 = vmax.f32 %v432_v26, 0.0  ;;  %v457_v44 = vpop.f32.mrf.mxu1 }
  0xae   : > { %v521_v5 = vmax.f32 %v457_v44, 0.0  ;;  %v611_v44 = vld [vmem:[%s1281_s2 + $0x78] sm:$0xff] }
  0xaf   : > { %v542_v46 = vadd.f32 %v511_v40, %v510_v42  ;;  %613 = vmatpush.msrb.mxu1 %v611_v44 }
  0xb2   : > { %v467_v29 = vpop.f32.mrf.mxu2 }
  0xb3   : > { %v1172_v39 = vpop.f32.mrf.mxu3  ;;  %v525_v16 = vmax.f32 %v467_v29, 0.0 }
  0xb4   : > { %v435_v28 = vpop.f32.mrf.mxu0 }
  0xb5   : > { %v512_v43 = vmax.f32 %v435_v28, 0.0  ;;  %v460_v58 = vpop.f32.mrf.mxu1 }
  0xb6   : > { %v522_v9 = vmax.f32 %v460_v58, 0.0 }
  0xb7   : > { %v543_v48 = vadd.f32 %v542_v46, %v512_v43 }
  0xba   : > { %v470_v31 = vpop.f32.mrf.mxu2 }
  0xbb   : > { %v495_v53 = vpop.f32.mrf.mxu3  ;;  %v526_v18 = vmax.f32 %v470_v31, 0.0  ;;  %v534_v31 = vmax.f32 %v1170_v35, 0.0  ;;  %v609_v35 = vld [vmem:[%s1281_s2 + $0x68] sm:$0xff] }
  0xbc   : > { %v437_v30 = vpop.f32.mrf.mxu0  ;;  %v536_v46 = vmax.f32 %v495_v53, 0.0 }
  0xbd   : > { %v513_v47 = vmax.f32 %v437_v30, 0.0  ;;  %v462_v7 = vpop.f32.mrf.mxu1 }
  0xbe   : > { %v523_v11 = vmax.f32 %v462_v7, 0.0  ;;  %v604_v7 = vld [vmem:[%s1281_s2 + $0x40] sm:$0xff] }
  0xbf   : > { %v544_v50 = vadd.f32 %v543_v48, %v513_v47 }
  0xc2   : > { %v472_v33 = vpop.f32.mrf.mxu2 }
  0xc3   : > { %v497_v2 = vpop.f32.mrf.mxu3  ;;  %v527_v21 = vmax.f32 %v472_v33, 0.0  ;;  %v535_v33 = vmax.f32 %v1172_v39, 0.0  ;;  %v608_v39 = vld [vmem:[%s1281_s2 + $0x60] sm:$0xff] }
  0xc4   : > { %v440_v32 = vpop.f32.mrf.mxu0  ;;  %v537_v48 = vmax.f32 %v497_v2, 0.0 }
  0xc5   : > { %v514_v49 = vmax.f32 %v440_v32, 0.0 }
  0xc7   : > { %v545_v54 = vadd.f32 %v544_v50, %v514_v49 }
  0xca   : > { %v475_v38 = vpop.f32.mrf.mxu2 }
  0xcb   : > { %v500_v15 = vpop.f32.mrf.mxu3  ;;  %v528_v23 = vmax.f32 %v475_v38, 0.0 }
  0xcc   : > { %v442_v34 = vpop.f32.mrf.mxu0  ;;  %v538_v50 = vmax.f32 %v500_v15, 0.0  ;;  %v596_v15 = vld [vmem:[%s1281_s2] sm:$0xff] }
  0xcd   : > { %v515_v51 = vmax.f32 %v442_v34, 0.0 }
  0xcf   : > { %v546_v56 = vadd.f32 %v545_v54, %v515_v51 }
  0xd2   : > { %v477_v45 = vpop.f32.mrf.mxu2 }
  0xd3   : > { %v529_v25 = vmax.f32 %v477_v45, 0.0  ;;  %v502_v28 = vpop.f32.mrf.mxu3  ;;  %v610_v45 = vld [vmem:[%s1281_s2 + $0x70] sm:$0xff] }
  0xd4   : > { %v445_v37 = vpop.f32.mrf.mxu0  ;;  %614 = vmatpush.msrb.mxu1 %v610_v45  ;;  %v539_v53 = vmax.f32 %v502_v28, 0.0 }
  0xd5   : > { %v516_v55 = vmax.f32 %v445_v37, 0.0 }
  0xd6   : > { %615 = vmatpush.msrb.mxu1 %v609_v35 }
  0xd7   : > { %v547_v60 = vadd.f32 %v546_v56, %v516_v55 }
  0xd8   : > { %616 = vmatpush.msrb.mxu1 %v608_v39 }
  0xda   : > { %v480_v59 = vpop.f32.mrf.mxu2 }
  0xdb   : > { %v530_v30 = vmax.f32 %v480_v59, 0.0  ;;  %v505_v43 = vpop.f32.mrf.mxu3 }
  0xdc   : > { %v447_v41 = vpop.f32.mrf.mxu0 }
  0xdd   : > { %v517_v57 = vmax.f32 %v447_v41, 0.0 }
  0xdf   : > { %v548_v62 = vadd.f32 %v547_v60, %v517_v57  ;;  %v540_v57 = vmax.f32 %v505_v43, 0.0 }
  0xe2   : > { %v482_v8 = vpop.f32.mrf.mxu2 }
  0xe3   : > { %v531_v34 = vmax.f32 %v482_v8, 0.0  ;;  %v507_v55 = vpop.f32.mrf.mxu3  ;;  %v603_v8 = vld [vmem:[%s1281_s2 + $0x38] sm:$0xff] }
  0xe4   : > { %v450_v52 = vpop.f32.mrf.mxu0  ;;  %v541_v59 = vmax.f32 %v507_v55, 0.0 }
  0xe5   : > { %v518_v61 = vmax.f32 %v450_v52, 0.0  ;;  %v607_v52 = vld [vmem:[%s1281_s2 + $0x58] sm:$0xff] }
  0xe6   : > { %617 = vmatpush.msrb.mxu1 %v607_v52 }
  0xe7   : > { %v549_v0 = vadd.f32 %v548_v62, %v518_v61 }
  0xea   : > { %v485_v20 = vpop.f32.mrf.mxu2 }
  0xeb   : > { %v532_v40 = vmax.f32 %v485_v20, 0.0 }
  0xec   : > { %v452_v63 = vpop.f32.mrf.mxu0 }
  0xed   : > { %v519_v1 = vmax.f32 %v452_v63, 0.0 }
  0xef   : > { %v550_v4 = vadd.f32 %v549_v0, %v519_v1 }
  0xf1   : > { %v551_v6 = vadd.f32 %v550_v4, %v520_v3 }
  0xf2   : > { %v487_v37 = vpop.f32.mrf.mxu2 }
  0xf3   : > { %v552_v10 = vadd.f32 %v551_v6, %v521_v5  ;;  %v533_v29 = vmax.f32 %v487_v37, 0.0  ;;  %v606_v5 = vld [vmem:[%s1281_s2 + $0x50] sm:$0xff]  ;;  %v605_v6 = vld [vmem:[%s1281_s2 + $0x48] sm:$0xff] }
  0xf4   : > { %618 = vmatpush.msrb.mxu1 %v606_v5 }
  0xf5   : > { %v553_v12 = vadd.f32 %v552_v10, %v522_v9  ;;  %v602_v9 = vld [vmem:[%s1281_s2 + $0x30] sm:$0xff]  ;;  %v601_v10 = vld [vmem:[%s1281_s2 + $0x28] sm:$0xff] }
  0xf6   : > { %619 = vmatpush.msrb.mxu1 %v605_v6 }
  0xf7   : > { %v554_v14 = vadd.f32 %v553_v12, %v523_v11  ;;  %v600_v11 = vld [vmem:[%s1281_s2 + $0x20] sm:$0xff]  ;;  %v599_v12 = vld [vmem:[%s1281_s2 + $0x18] sm:$0xff] }
  0xf8   : > { %620 = vmatpush.msrb.mxu1 %v604_v7 }
  0xf9   : > { %v555_v17 = vadd.f32 %v554_v14, %v524_v13  ;;  %v598_v13 = vld [vmem:[%s1281_s2 + $0x10] sm:$0xff]  ;;  %v597_v14 = vld [vmem:[%s1281_s2 + $0x8] sm:$0xff] }
  0xfa   : > { %621 = vmatpush.msrb.mxu1 %v603_v8 }
  0xfb   : > { %v556_v19 = vadd.f32 %v555_v17, %v525_v16 }
  0xfc   : > { %622 = vmatpush.msrb.mxu1 %v602_v9 }
  0xfd   : > { %v557_v22 = vadd.f32 %v556_v19, %v526_v18 }
  0xfe   : > { %623 = vmatpush.msrb.mxu1 %v601_v10 }
  0xff   : > { %v558_v24 = vadd.f32 %v557_v22, %v527_v21 }
 0x100   : > { %624 = vmatpush.msrb.mxu1 %v600_v11 }
 0x101   : > { %v559_v26 = vadd.f32 %v558_v24, %v528_v23 }
 0x102   : > { %625 = vmatpush.msrb.mxu1 %v599_v12 }
 0x103   : > { %v560_v32 = vadd.f32 %v559_v26, %v529_v25  ;;  %v612_v26 = vld [vmem:[%s1282_s3] sm:$0x1] }
 0x104   : > { %626 = vmatpush.msrb.mxu1 %v598_v13 }
 0x105   : > { %v561_v36 = vadd.f32 %v560_v32, %v530_v30 }
 0x106   : > { %627 = vmatpush.msrb.mxu1 %v597_v14 }
 0x107   : > { %v562_v27 = vadd.f32 %v561_v36, %v531_v34 }
 0x108   : > { %628 = vmatpush.msrb.mxu1 %v596_v15 }
 0x109   : > { %v563_v41 = vadd.f32 %v562_v27, %v532_v40 }
 0x10b   : > { %v564_v42 = vadd.f32 %v563_v41, %v533_v29 }
 0x10d   : > { %v565_v38 = vadd.f32 %v564_v42, %v534_v31 }
 0x10f   : > { %v566_v47 = vadd.f32 %v565_v38, %v535_v33 }
 0x111   : > { %v567_v49 = vadd.f32 %v566_v47, %v536_v46 }
 0x113   : > { %v568_v51 = vadd.f32 %v567_v49, %v537_v48 }
 0x115   : > { %v569_v54 = vadd.f32 %v568_v51, %v538_v50 }
 0x117   : > { %v570_v56 = vadd.f32 %v569_v54, %v539_v53 }
 0x119   : > { %v571_v58 = vadd.f32 %v570_v56, %v540_v57 }
 0x11b   : > { %v572_v60 = vadd.f32 %v571_v58, %v541_v59 }
 0x11d   : > { %v573_v61 = vrot.slane %v572_v60, 4 }
 0x11f   : > { %v574_v62 = vadd.f32 %v573_v61, %v572_v60 }
 0x121   : > { %v575_v63 = vrot.slane %v574_v62, 2 }
 0x123   : > { %v576_v0 = vadd.f32 %v575_v63, %v574_v62 }
 0x125   : > { %v577_v1 = vrot.slane %v576_v0, 1 }
 0x127   : > { %v578_v2 = vadd.f32 %v577_v1, %v576_v0 }
 0x129   : > { %v579_v3 = vmul.f32 0.00390625, %v578_v2 }
 0x12b   : > { %v580_v4 = vmul.f32 %v579_v3, %v579_v3 }
 0x12d   : > { %581 = vadd.xlane.f32.xlu0 %v580_v4 }
 0x1a0   : > { %v582_v16 = vpop.xlane.xlu0 %581 }
 0x1a1   : > { %v583_v17 = vmax.f32 %v582_v16, 1e-24 }
 0x1a3   : > { %941 = vrsqrt.f32 %v583_v17  ;;  %vm590_vm4 = vweird.f32 %v583_v17 }
 0x1a9   : > { %v942_v18 = vpop.eup %941 }
 0x1aa   : > { %v585_v19 = vmul.f32 %v942_v18, %v583_v17  ;;  %vm591_vm3 = vweird.f32 %v942_v18 }
 0x1ab   : > { %vm592_vm5 = vmor %vm590_vm4, %vm591_vm3 }
 0x1ac   : > { %v586_v20 = vmul.f32 %v942_v18, %v585_v19 }
 0x1ae   : > { %v587_v21 = vmul.f32 0.5, %v586_v20 }
 0x1b0   : > { %v588_v22 = vsub.f32 1.5, %v587_v21 }
 0x1b2   : > { %v589_v23 = vmul.f32 %v942_v18, %v588_v22 }
 0x1b4   : > { %v593_v24 = vsel %vm592_vm5, %v942_v18, %v589_v23 }
 0x1b5   : > { %v594_v25 = vmul.f32 %v593_v24, %v579_v3 }
 0x1b7   : > { %629 = vmatmul.f32.vlgmr.msrb.gmra.mxu1 %v594_v25  ;;  %595 = vst [vmem:[%s220_s17] sm:$0x1] %v594_v25 }
 0x234   : > { %v630_v28 = vpop.f32.mrf.mxu1 }
 0x235   : > { %v631_v30 = vadd.f32 %v630_v28, %v612_v26 }
 0x237   : > { %v634_v32 = vsel %vm633_vm6, %v631_v30, -inf }
 0x238   : > { %635 = vmax.xlane.f32.xlu0 %v634_v32 }
 0x2ab   : > { %v636_v34 = vpop.xlane.xlu0 %635 }
 0x2ac   : > { %v637_v36 = vsub.f32 %v631_v30, %v636_v34 }
 0x2ae   : > { %v638_v37 = vmul.f32 1.442695, %v637_v36 }
 0x2b0   : > { %943 = vpow2.f32 %v638_v37 }
 0x2b6   : > { %v944_v27 = vpop.eup %943 }
 0x2b7   : > { %v640_v40 = vsel %vm633_vm6, %v944_v27, 0.0 }
 0x2b8   : > { %641 = vadd.xlane.f32.xlu1 %v640_v40 }
 0x2b9   : > { %974 = shalt.err (!%p971_p3)
}
 0x2ba   : > { %896 = dma.vmem_to_hbm [thread:$0]  (%p1112_p5), %s675_s7, 16, %s677_s8, %s660_s9  }
 0x2bb   : > { %s685_s26 = scalar_lea.hbm %s1284_s5, %s1095_s22  ;;  %s226_s30 = scalar_lea.vmem [#allocation4], %s1225_s16 }
 0x2bc   : > { %s687_s6 = sshll.u32 %s226_s30, 4  ;;  %s689_s7 = sshll.u32 %s685_s26, 4  ;;  %s688_s6 = int_to_ptr.vmem [resolvable:$true] %s687_s6  ;;  %s690_s7 = int_to_ptr.hbm [resolvable:$true] %s689_s7 }
 0x2bd   : > { %s664_s8 = scalar_lea.sflag [#allocation5], %s1225_s16  ;;  %s989_s9 = sshra.s32 %s690_s7, 4  ;;  %s990_s9 = int_to_ptr.hbm [resolvable:$true] %s989_s9 }
 0x2be   : > { %s991_s10 = scalar_lea.hbm %s990_s9, 1  ;;  %s995_s12 = scalar_lea.hbm %s1284_s5, 2 }
 0x2bf   : > { %p992_p4 = scmp.ne.s32.totalorder %s990_s9, %s991_s10  ;;  %p996_p9 = scmp.lt.s32.totalorder %s990_s9, %s1284_s5 }
 0x2c0   : > { %p997_p10 = scmp.lt.s32.totalorder %s995_s12, %s991_s10 }
 0x2c1   : > { %p993_p7 = pnand %p992_p4, %p1112_p5 }
 0x2c2   : > { %p998_p11 = por %p997_p10, %p996_p9 }
 0x2c3   : > { %p994_p8 = pneg %p993_p7 }
 0x2c5   : > { %p999_p12 = pnand %p998_p11, %p994_p8 }
 0x32b   : > { %v642_v41 = vpop.xlane.xlu1 %641 }
 0x32c   : > { %945 = vrcp.f32 %v642_v41  ;;  %v654_v43 = vand.u32 2147483648, %v642_v41  ;;  %v652_v38 = vand.u32 2147483647, %v642_v41  ;;  %vm648_vm8 = vweird.f32 %v642_v41 }
 0x32e   : > { %v655_v45 = vor.u32 1.1754944e-38, %v654_v43  ;;  %vm653_vm10 = vcmp.eq.f32.partialorder %v652_v38, 8.507059e+37 }
 0x332   : > { %v946_v29 = vpop.eup %945 }
 0x333   : > { %v644_v31 = vmul.f32 %v946_v29, %v642_v41  ;;  %vm649_vm7 = vweird.f32 %v946_v29 }
 0x334   : > { %vm650_vm9 = vmor %vm648_vm8, %vm649_vm7 }
 0x335   : > { %v645_v42 = vsub.f32 1.0, %v644_v31 }
 0x337   : > { %v646_v33 = vmul.f32 %v946_v29, %v645_v42 }
 0x339   : > { %v647_v44 = vadd.f32 %v946_v29, %v646_v33 }
 0x33b   : > { %v651_v46 = vsel %vm650_vm9, %v946_v29, %v647_v44 }
 0x33c   : > { %v656_v47 = vsel %vm653_vm10, %v655_v45, %v651_v46 }
 0x33d   : > { %v657_v35 = vmul.f32 %v944_v27, %v656_v47 }
 0x33f   : > { %658 = vst [vmem:[%s226_s30] sm:$0x1] %v657_v35 }
 0x340   : > { %1002 = shalt.err (!%p999_p12)
}
 0x341   : > { %897 = dma.vmem_to_hbm [thread:$0]  (%p1112_p5), %s688_s6, 16, %s690_s7, %s664_s8  }
 0x342 PF: > { %p907_p13 = scmp.ge.s32.totalorder %s1041_s21, 2  ;;  %s701_s16 = sand.u32 1, %s1029_s18  }
 0x343   : > { %s702_s15 = scalar_lea.sflag [#allocation3], %s701_s16 }
 0x344   : > { %p901_p0 = pnand %p907_p13, %p1116_p6 }
 0x346   : > { %p902_p1 = pneg %p901_p0 }
 0x348   : > { %1020 = dma.done.wait (%p902_p1), %s702_s15, 16  }
 0x349   : > { %1022 = vsyncadd (%p902_p1), %s702_s15, 4294967280  ;;  %s711_s23 = scalar_lea.sflag [#allocation5], %s701_s16 }
 0x34a   : > { %1024 = dma.done.wait (%p902_p1), %s711_s23, 16  }
 0x34b   : > { %1026 = vsyncadd (%p902_p1), %s711_s23, 4294967280  ;;  %p19_p5 = scmp.ge.s32.totalorder %s1099_s24, 4   ;;  %s1287_s18 = smov %s1033_s19 }
 0x34c   : > { %s1288_s19 = smov %s1037_s20  ;;  %s1289_s20 = smov %s1110_s27 }
 0x34d   : > { %s1290_s21 = smov %s1099_s24  ;;  %21 = sbr.rel (!%p19_p5) target bundleno = 5 (0x5), region = 88 }
 0x352   :  { %716 = vsyncpa [#allocation3], 1 }
 0x353   :  { %718 = vsyncpa [#allocation3 + $0x1], 1 }
 0x354   :  { %719 = vsyncpa [#allocation5], 1 }
 0x355   :  { %721 = vsyncpa [#allocation5 + $0x1], 1 }

</bundles_post_ra>
